<compile_context>
chip_gen: v5e
topology: v5e:2x2
jax: 0.10.0
libtpu: 0.0.40
codegen_flags: <defaults>
</compile_context>

<pallas_src>
import jax
import jax.numpy as jnp
from jax.experimental import pallas as pl
from jax.experimental.pallas import tpu as pltpu

_BN_EPS = 1e-5


# ----------------------------- in-kernel helpers ------------------------------

def _pad_rows(y):
    """Reflection pad (pad=1) along H on a lane-dense (H, W*C) slab, in
    registers: rows -> [row1, row0..row(H-1), row(H-2)]."""
    H = y.shape[0]
    return jnp.concatenate([y[1:2], y, y[H - 2:H - 1]], axis=0)


def _conv3x3_banded(rows, b_ref):
    """3x3 conv on a row-reflection-padded lane-dense slab.

    rows:  (H+2, W*C) f32 — rows already reflection padded along H.
    b_ref: (3, W*C, W*C) bf16 banded weights; the 3 kw taps and the width-axis
           reflection pad are folded into the band structure, so no lane-axis
           shuffling / im2col happens here.
    returns (H, W*C) f32 conv output (f32 MXU accumulation).
    """
    H = rows.shape[0] - 2
    acc = jnp.dot(rows[0:H].astype(jnp.bfloat16), b_ref[0],
                  preferred_element_type=jnp.float32)
    acc = acc + jnp.dot(rows[1:H + 1].astype(jnp.bfloat16), b_ref[1],
                        preferred_element_type=jnp.float32)
    acc = acc + jnp.dot(rows[2:H + 2].astype(jnp.bfloat16), b_ref[2],
                        preferred_element_type=jnp.float32)
    return acc


def _emit_row_stats(acc, sum_ref, sq_ref):
    """Per-image BN partial sums, reduced over H only -> lane-dense (1,1,W*C).
    The wrapper finishes the (N, W) reduction on a tiny array."""
    sum_ref[...] = jnp.sum(acc, axis=0, keepdims=True)[None]
    sq_ref[...] = jnp.sum(acc * acc, axis=0, keepdims=True)[None]


# ------------------------------- kernel bodies --------------------------------

def _conv1_kernel(x_ref, b_ref, h1p_ref, sum_ref, sq_ref):
    """Block-1 conv on one image.  Input is the unpadded lane-dense image; the
    H-reflection halo is built in registers (the W-reflection lives in the
    banded weights).  Output is written ALREADY row-padded with one dense store,
    plus per-image BN partial statistics."""
    rows = _pad_rows(x_ref[0])                      # (H+2, W*C) f32
    acc = _conv3x3_banded(rows, b_ref)              # (H,   W*C) f32
    _emit_row_stats(acc, sum_ref, sq_ref)
    h1p_ref[...] = _pad_rows(acc).astype(jnp.bfloat16)[None]


def _conv2_kernel(h1p_ref, scale_ref, shift_ref, b_ref, h2_ref, sum_ref, sq_ref):
    """BN1 (per-channel scale/shift FMA, lane-dense) + ReLU fused with the
    block-2 conv.  BN/ReLU are pointwise, so applying them on the row-padded
    slab equals padding the normalized activation."""
    hp = h1p_ref[0].astype(jnp.float32)             # (H+2, W*C)
    a = jnp.maximum(hp * scale_ref[...] + shift_ref[...], 0.0)
    acc = _conv3x3_banded(a, b_ref)                 # (H, W*C) f32
    _emit_row_stats(acc, sum_ref, sq_ref)
    h2_ref[...] = acc.astype(jnp.bfloat16)[None]    # bf16: halves finalize HBM read


def _finalize_kernel(h2_ref, scale_ref, shift_ref, res_ref, o_ref):
    """BN2 (scale/shift FMA) + residual add on lane-dense (1, H, W*C) slabs."""
    o_ref[...] = (h2_ref[...].astype(jnp.float32) * scale_ref[...]
                  + shift_ref[...] + res_ref[...])


# ------------------------------- wrapper --------------------------------------

def _banded_weights(w_hwio, W):
    """Fold the 3 kw taps and the width-axis reflection pad (pad=1) of a 3x3
    conv into 3 banded (W*C, W*C) matrices (one per kh tap), bf16.

      B[kh][j*C+ci, w*C+co] = sum_{kw : refl_W(w+kw-1) == j} w_hwio[kh, kw, ci, co]
    """
    C = w_hwio.shape[-1]
    wout = jnp.arange(W)
    src = wout[None, :] + jnp.arange(3)[:, None] - 1           # (kw, wout)
    src = jnp.where(src < 0, -src, src)                        # reflect left
    src = jnp.where(src > W - 1, 2 * (W - 1) - src, src)       # reflect right
    sel = (src[:, :, None] == jnp.arange(W)[None, None, :])    # (kw, wout, j)
    sel = sel.astype(w_hwio.dtype)
    band = jnp.einsum("kwj,hkio->hjiwo", sel, w_hwio)          # (3, W, C, W, C)
    return band.reshape(3, W * C, W * C).astype(jnp.bfloat16)


def _bn_scale_shift(psum, psq, gamma, beta, W, count):
    """Fold global batch statistics into a per-channel (scale, shift) FMA."""
    C = gamma.shape[0]
    s = jnp.sum(psum.reshape(-1, W, C), axis=(0, 1))           # (C,)
    sq = jnp.sum(psq.reshape(-1, W, C), axis=(0, 1))           # (C,)
    mean = s / count
    var = jnp.maximum(sq / count - mean * mean, 0.0)           # biased variance
    scale = gamma * jax.lax.rsqrt(var + _BN_EPS)
    shift = beta - mean * scale
    return scale, shift


def _compiler_params(*block_byte_counts):
    """Scoped-VMEM limit derived from the double-buffered block sizes (plus
    headroom) instead of a hard-coded per-generation constant; never below the
    16 MiB scoped default and far under v7x's 64 MiB physical VMEM here."""
    need = 2 * int(sum(block_byte_counts)) + (4 << 20)
    return pltpu.CompilerParams(
        dimension_semantics=("parallel",),
        vmem_limit_bytes=max(need, 16 << 20),
    )


@jax.jit
def resnet_block_forward(x_nchw, w1_hwio, gamma1, beta1, w2_hwio, gamma2, beta2):
    """ResnetBlock forward.  x: NCHW f32; conv weights HWIO (3,3,C,C), no bias."""
    N, C, H, W = x_nchw.shape
    WC = W * C
    count = N * H * W

    # NCHW -> NHWC once; everything below runs on lane-dense (N, H(+2), W*C)
    # row-major views (free reshapes of the same HBM buffers).
    x = jnp.transpose(x_nchw, (0, 2, 3, 1)).astype(jnp.float32)
    x_l = x.reshape(N, H, WC)

    b1 = _banded_weights(w1_hwio, W)                 # (3, WC, WC) bf16
    b2 = _banded_weights(w2_hwio, W)

    # ---- block 1: conv -> (row-reflection-padded bf16 output, partial stats)
    cp1 = _compiler_params(H * WC * 4, 3 * WC * WC * 2,
                           (H + 2) * WC * 2, 2 * WC * 4)
    h1p, s1, q1 = pl.pallas_call(
        _conv1_kernel,
        grid=(N,),
        in_specs=[
            pl.BlockSpec((1, H, WC), lambda n: (n, 0, 0)),
            pl.BlockSpec((3, WC, WC), lambda n: (0, 0, 0)),
        ],
        out_specs=(
            pl.BlockSpec((1, H + 2, WC), lambda n: (n, 0, 0)),
            pl.BlockSpec((1, 1, WC), lambda n: (n, 0, 0)),
            pl.BlockSpec((1, 1, WC), lambda n: (n, 0, 0)),
        ),
        out_shape=(
            jax.ShapeDtypeStruct((N, H + 2, WC), jnp.bfloat16),
            jax.ShapeDtypeStruct((N, 1, WC), jnp.float32),
            jax.ShapeDtypeStruct((N, 1, WC), jnp.float32),
        ),
        compiler_params=cp1,
    )(x_l, b1)
    scale1, shift1 = _bn_scale_shift(s1, q1, gamma1, beta1, W, count)

    # ---- block 2: BN1+ReLU fused with conv2 -> (bf16 conv2 output, partial stats)
    cp2 = _compiler_params((H + 2) * WC * 2, 2 * WC * 4, 3 * WC * WC * 2,
                           H * WC * 2, 2 * WC * 4)
    h2, s2, q2 = pl.pallas_call(
        _conv2_kernel,
        grid=(N,),
        in_specs=[
            pl.BlockSpec((1, H + 2, WC), lambda n: (n, 0, 0)),
            pl.BlockSpec((1, WC), lambda n: (0, 0)),
            pl.BlockSpec((1, WC), lambda n: (0, 0)),
            pl.BlockSpec((3, WC, WC), lambda n: (0, 0, 0)),
        ],
        out_specs=(
            pl.BlockSpec((1, H, WC), lambda n: (n, 0, 0)),
            pl.BlockSpec((1, 1, WC), lambda n: (n, 0, 0)),
            pl.BlockSpec((1, 1, WC), lambda n: (n, 0, 0)),
        ),
        out_shape=(
            jax.ShapeDtypeStruct((N, H, WC), jnp.bfloat16),
            jax.ShapeDtypeStruct((N, 1, WC), jnp.float32),
            jax.ShapeDtypeStruct((N, 1, WC), jnp.float32),
        ),
        compiler_params=cp2,
    )(h1p,
      jnp.tile(scale1, W).reshape(1, WC),            # lane-dense per-channel FMA
      jnp.tile(shift1, W).reshape(1, WC),
      b2)
    scale2, shift2 = _bn_scale_shift(s2, q2, gamma2, beta2, W, count)

    # ---- finalize: BN2 + residual on lane-dense (1, H, W*C) slabs
    cp3 = _compiler_params(H * WC * 2, 2 * WC * 4, H * WC * 4, H * WC * 4)
    y = pl.pallas_call(
        _finalize_kernel,
        grid=(N,),
        in_specs=[
            pl.BlockSpec((1, H, WC), lambda n: (n, 0, 0)),
            pl.BlockSpec((1, WC), lambda n: (0, 0)),
            pl.BlockSpec((1, WC), lambda n: (0, 0)),
            pl.BlockSpec((1, H, WC), lambda n: (n, 0, 0)),
        ],
        out_specs=pl.BlockSpec((1, H, WC), lambda n: (n, 0, 0)),
        out_shape=jax.ShapeDtypeStruct((N, H, WC), jnp.float32),
        compiler_params=cp3,
    )(h2,
      jnp.tile(scale2, W).reshape(1, WC),
      jnp.tile(shift2, W).reshape(1, WC),
      x_l)

    return jnp.transpose(y.reshape(N, H, W, C), (0, 3, 1, 2))


# ------------------------------ reference --------------------------------------

def _reference(x_nchw, w1_hwio, gamma1, beta1, w2_hwio, gamma2, beta2):
    """Pure-JAX f32 reference mirroring the PyTorch module."""
    def block(x, w_hwio, gamma, beta, relu):
        xp = jnp.pad(x, ((0, 0), (0, 0), (1, 1), (1, 1)), mode="reflect")
        w_oihw = jnp.transpose(w_hwio, (3, 2, 0, 1))
        y = jax.lax.conv_general_dilated(
            xp, w_oihw, window_strides=(1, 1), padding="VALID",
            dimension_numbers=("NCHW", "OIHW", "NCHW"))
        mean = y.mean(axis=(0, 2, 3), keepdims=True)
        var = jnp.square(y - mean).mean(axis=(0, 2, 3), keepdims=True)
        y = (y - mean) / jnp.sqrt(var + _BN_EPS)
        y = y * gamma.reshape(1, -1, 1, 1) + beta.reshape(1, -1, 1, 1)
        if relu:
            y = jnp.maximum(y, 0.0)
        return y

    h = block(x_nchw, w1_hwio, gamma1, beta1, True)
    return block(h, w2_hwio, gamma2, beta2, False) + x_nchw


if __name__ == "__main__":
    # ResnetBlock(dim=8): N=2, C=8, H=W=16  (W*C = 128 -> fully lane-dense).
    N, C, H, W = 2, 8, 16, 16

    key = jax.random.PRNGKey(0)
    kx, kw1, kw2 = jax.random.split(key, 3)

    x = jax.random.normal(kx, (N, C, H, W), jnp.float32)

    fan_in = C * 3 * 3
    bound = 1.0 / (fan_in ** 0.5)
    w1 = jax.random.uniform(kw1, (3, 3, C, C), jnp.float32, -bound, bound)  # HWIO
    w2 = jax.random.uniform(kw2, (3, 3, C, C), jnp.float32, -bound, bound)
    gamma1 = jnp.ones((C,), jnp.float32)
    beta1 = jnp.zeros((C,), jnp.float32)
    gamma2 = jnp.ones((C,), jnp.float32)
    beta2 = jnp.zeros((C,), jnp.float32)

    out = resnet_block_forward(x, w1, gamma1, beta1, w2, gamma2, beta2)
    out = jax.block_until_ready(out)

    ref = _reference(x, w1, gamma1, beta1, w2, gamma2, beta2)
    assert out.shape == (N, C, H, W)
    err = float(jnp.max(jnp.abs(out - ref)))
    # MXU operands and the h1p/h2 intermediates are bf16 (f32 accumulation), so
    # the tolerance versus the pure-f32 reference is loosened accordingly.
    assert err < 5e-2, f"max abs err {err}"

    print("KERNEL_OK")
</pallas_src>

<mosaic_0001>
module attributes {stable_mosaic.version = 11 : i64} {
  func.func @_conv1_kernel(%arg0: i32, %arg1: memref<1x16x128xf32, #tpu.memory_space<vmem>>, %arg2: memref<3x128x128xbf16, #tpu.memory_space<vmem>>, %arg3: memref<1x18x128xbf16, #tpu.memory_space<vmem>>, %arg4: memref<1x1x128xf32, #tpu.memory_space<vmem>>, %arg5: memref<1x1x128xf32, #tpu.memory_space<vmem>>) attributes {dimension_semantics = [#tpu.dimension_semantics<parallel>], iteration_bounds = array<i64: 2>, scalar_prefetch = 0 : i64, scratch_operands = 0 : i64, tpu.core_type = #tpu.core_type<tc>, window_params = [{transform_indices = @transform_0, window_bounds = array<i64: 1, 16, 128>}, {pipeline_mode = #tpu.pipeline_mode<synchronous>, transform_indices = @transform_1, window_bounds = array<i64: 3, 128, 128>}, {transform_indices = @transform_2, window_bounds = array<i64: 1, 18, 128>}, {transform_indices = @transform_3, window_bounds = array<i64: 1, 1, 128>}, {transform_indices = @transform_4, window_bounds = array<i64: 1, 1, 128>}]} {
    %c0 = arith.constant 0 : index
    %c0_0 = arith.constant 0 : index
    %c0_1 = arith.constant 0 : index
    %0 = vector.load %arg1[%c0, %c0_0, %c0_1] : memref<1x16x128xf32, #tpu.memory_space<vmem>>, vector<1x16x128xf32>
    %1 = vector.shape_cast %0 : vector<1x16x128xf32> to vector<16x128xf32>
    %2 = vector.extract_strided_slice %1 {offsets = [1, 0], sizes = [1, 128], strides = [1, 1]} : vector<16x128xf32> to vector<1x128xf32>
    %3 = vector.extract_strided_slice %1 {offsets = [14, 0], sizes = [1, 128], strides = [1, 1]} : vector<16x128xf32> to vector<1x128xf32>
    %4 = tpu.concatenate %2, %1, %3 in 0 : vector<1x128xf32>, vector<16x128xf32>, vector<1x128xf32> -> vector<18x128xf32>
    %5 = vector.extract_strided_slice %4 {offsets = [0, 0], sizes = [16, 128], strides = [1, 1]} : vector<18x128xf32> to vector<16x128xf32>
    %6 = arith.truncf %5 : vector<16x128xf32> to vector<16x128xbf16>
    %c0_2 = arith.constant 0 : index
    %c0_3 = arith.constant 0 : index
    %c0_4 = arith.constant 0 : index
    %7 = vector.load %arg2[%c0_2, %c0_3, %c0_4] : memref<3x128x128xbf16, #tpu.memory_space<vmem>>, vector<1x128x128xbf16>
    %8 = vector.shape_cast %7 : vector<1x128x128xbf16> to vector<128x128xbf16>
    %cst = arith.constant dense<0.000000e+00> : vector<16x128xf32>
    %9 = tpu.matmul %6, %8, %cst {dimension_numbers = #tpu.dot_dimension_numbers<[1], [0], [0], [1], [0, 0, 1, 1], [], []>} : vector<16x128xbf16>, vector<128x128xbf16>, vector<16x128xf32> -> vector<16x128xf32>
    %10 = vector.extract_strided_slice %4 {offsets = [1, 0], sizes = [16, 128], strides = [1, 1]} : vector<18x128xf32> to vector<16x128xf32>
    %11 = arith.truncf %10 : vector<16x128xf32> to vector<16x128xbf16>
    %c1 = arith.constant 1 : index
    %c0_5 = arith.constant 0 : index
    %c0_6 = arith.constant 0 : index
    %12 = vector.load %arg2[%c1, %c0_5, %c0_6] : memref<3x128x128xbf16, #tpu.memory_space<vmem>>, vector<1x128x128xbf16>
    %13 = vector.shape_cast %12 : vector<1x128x128xbf16> to vector<128x128xbf16>
    %cst_7 = arith.constant dense<0.000000e+00> : vector<16x128xf32>
    %14 = tpu.matmul %11, %13, %cst_7 {dimension_numbers = #tpu.dot_dimension_numbers<[1], [0], [0], [1], [0, 0, 1, 1], [], []>} : vector<16x128xbf16>, vector<128x128xbf16>, vector<16x128xf32> -> vector<16x128xf32>
    %15 = arith.addf %9, %14 : vector<16x128xf32>
    %16 = vector.extract_strided_slice %4 {offsets = [2, 0], sizes = [16, 128], strides = [1, 1]} : vector<18x128xf32> to vector<16x128xf32>
    %17 = arith.truncf %16 : vector<16x128xf32> to vector<16x128xbf16>
    %c2 = arith.constant 2 : index
    %c0_8 = arith.constant 0 : index
    %c0_9 = arith.constant 0 : index
    %18 = vector.load %arg2[%c2, %c0_8, %c0_9] : memref<3x128x128xbf16, #tpu.memory_space<vmem>>, vector<1x128x128xbf16>
    %19 = vector.shape_cast %18 : vector<1x128x128xbf16> to vector<128x128xbf16>
    %cst_10 = arith.constant dense<0.000000e+00> : vector<16x128xf32>
    %20 = tpu.matmul %17, %19, %cst_10 {dimension_numbers = #tpu.dot_dimension_numbers<[1], [0], [0], [1], [0, 0, 1, 1], [], []>} : vector<16x128xbf16>, vector<128x128xbf16>, vector<16x128xf32> -> vector<16x128xf32>
    %21 = arith.addf %15, %20 : vector<16x128xf32>
    %cst_11 = arith.constant dense<0.000000e+00> : vector<128xf32>
    %22 = vector.multi_reduction <add>, %21, %cst_11 [0] : vector<16x128xf32> to vector<128xf32>
    %23 = vector.shape_cast %22 : vector<128xf32> to vector<1x128xf32>
    %24 = vector.shape_cast %23 : vector<1x128xf32> to vector<1x1x128xf32>
    %c0_12 = arith.constant 0 : index
    %c0_13 = arith.constant 0 : index
    %c0_14 = arith.constant 0 : index
    %25 = vector.load %arg4[%c0_12, %c0_13, %c0_14] : memref<1x1x128xf32, #tpu.memory_space<vmem>>, vector<1x1x128xf32>
    tpu.vector_store %arg4[%c0_12, %c0_13, %c0_14], %24 {strides = array<i32>} : memref<1x1x128xf32, #tpu.memory_space<vmem>>, vector<1x1x128xf32>,
    %26 = arith.mulf %21, %21 : vector<16x128xf32>
    %cst_15 = arith.constant dense<0.000000e+00> : vector<128xf32>
    %27 = vector.multi_reduction <add>, %26, %cst_15 [0] : vector<16x128xf32> to vector<128xf32>
    %28 = vector.shape_cast %27 : vector<128xf32> to vector<1x128xf32>
    %29 = vector.shape_cast %28 : vector<1x128xf32> to vector<1x1x128xf32>
    %c0_16 = arith.constant 0 : index
    %c0_17 = arith.constant 0 : index
    %c0_18 = arith.constant 0 : index
    %30 = vector.load %arg5[%c0_16, %c0_17, %c0_18] : memref<1x1x128xf32, #tpu.memory_space<vmem>>, vector<1x1x128xf32>
    tpu.vector_store %arg5[%c0_16, %c0_17, %c0_18], %29 {strides = array<i32>} : memref<1x1x128xf32, #tpu.memory_space<vmem>>, vector<1x1x128xf32>,
    %31 = vector.extract_strided_slice %21 {offsets = [1, 0], sizes = [1, 128], strides = [1, 1]} : vector<16x128xf32> to vector<1x128xf32>
    %32 = vector.extract_strided_slice %21 {offsets = [14, 0], sizes = [1, 128], strides = [1, 1]} : vector<16x128xf32> to vector<1x128xf32>
    %33 = tpu.concatenate %31, %21, %32 in 0 : vector<1x128xf32>, vector<16x128xf32>, vector<1x128xf32> -> vector<18x128xf32>
    %34 = arith.truncf %33 : vector<18x128xf32> to vector<18x128xbf16>
    %35 = vector.shape_cast %34 : vector<18x128xbf16> to vector<1x18x128xbf16>
    %c0_19 = arith.constant 0 : index
    %c0_20 = arith.constant 0 : index
    %c0_21 = arith.constant 0 : index
    %36 = vector.load %arg3[%c0_19, %c0_20, %c0_21] : memref<1x18x128xbf16, #tpu.memory_space<vmem>>, vector<1x18x128xbf16>
    tpu.vector_store %arg3[%c0_19, %c0_20, %c0_21], %35 {strides = array<i32>} : memref<1x18x128xbf16, #tpu.memory_space<vmem>>, vector<1x18x128xbf16>,
    return
  }
  func.func @transform_0(%arg0: i32) -> (i32, i32, i32) {
    %c0_i32 = arith.constant 0 : i32
    %c0_i32_0 = arith.constant 0 : i32
    %c0_i32_1 = arith.constant 0 : i32
    return %arg0, %c0_i32, %c0_i32_0 : i32, i32, i32
  }
  func.func @transform_1(%arg0: i32) -> (i32, i32, i32) {
    %c0_i32 = arith.constant 0 : i32
    %c0_i32_0 = arith.constant 0 : i32
    %c0_i32_1 = arith.constant 0 : i32
    %c0_i32_2 = arith.constant 0 : i32
    return %c0_i32, %c0_i32_0, %c0_i32_1 : i32, i32, i32
  }
  func.func @transform_2(%arg0: i32) -> (i32, i32, i32) {
    %c0_i32 = arith.constant 0 : i32
    %c0_i32_0 = arith.constant 0 : i32
    %c0_i32_1 = arith.constant 0 : i32
    return %arg0, %c0_i32, %c0_i32_0 : i32, i32, i32
  }
  func.func @transform_3(%arg0: i32) -> (i32, i32, i32) {
    %c0_i32 = arith.constant 0 : i32
    %c0_i32_0 = arith.constant 0 : i32
    %c0_i32_1 = arith.constant 0 : i32
    return %arg0, %c0_i32, %c0_i32_0 : i32, i32, i32
  }
  func.func @transform_4(%arg0: i32) -> (i32, i32, i32) {
    %c0_i32 = arith.constant 0 : i32
    %c0_i32_0 = arith.constant 0 : i32
    %c0_i32_1 = arith.constant 0 : i32
    return %arg0, %c0_i32, %c0_i32_0 : i32, i32, i32
  }
}

module attributes {stable_mosaic.version = 11 : i64} {
  func.func @_conv2_kernel(%arg0: i32, %arg1: memref<1x18x128xbf16, #tpu.memory_space<vmem>>, %arg2: memref<1x128xf32, #tpu.memory_space<vmem>>, %arg3: memref<1x128xf32, #tpu.memory_space<vmem>>, %arg4: memref<3x128x128xbf16, #tpu.memory_space<vmem>>, %arg5: memref<1x16x128xbf16, #tpu.memory_space<vmem>>, %arg6: memref<1x1x128xf32, #tpu.memory_space<vmem>>, %arg7: memref<1x1x128xf32, #tpu.memory_space<vmem>>) attributes {dimension_semantics = [#tpu.dimension_semantics<parallel>], iteration_bounds = array<i64: 2>, scalar_prefetch = 0 : i64, scratch_operands = 0 : i64, tpu.core_type = #tpu.core_type<tc>, window_params = [{transform_indices = @transform_0, window_bounds = array<i64: 1, 18, 128>}, {pipeline_mode = #tpu.pipeline_mode<synchronous>, transform_indices = @transform_1, window_bounds = array<i64: 1, 128>}, {pipeline_mode = #tpu.pipeline_mode<synchronous>, transform_indices = @transform_2, window_bounds = array<i64: 1, 128>}, {pipeline_mode = #tpu.pipeline_mode<synchronous>, transform_indices = @transform_3, window_bounds = array<i64: 3, 128, 128>}, {transform_indices = @transform_4, window_bounds = array<i64: 1, 16, 128>}, {transform_indices = @transform_5, window_bounds = array<i64: 1, 1, 128>}, {transform_indices = @transform_6, window_bounds = array<i64: 1, 1, 128>}]} {
    %c0 = arith.constant 0 : index
    %c0_0 = arith.constant 0 : index
    %c0_1 = arith.constant 0 : index
    %0 = vector.load %arg1[%c0, %c0_0, %c0_1] : memref<1x18x128xbf16, #tpu.memory_space<vmem>>, vector<1x18x128xbf16>
    %1 = vector.shape_cast %0 : vector<1x18x128xbf16> to vector<18x128xbf16>
    %2 = arith.extf %1 : vector<18x128xbf16> to vector<18x128xf32>
    %c0_2 = arith.constant 0 : index
    %c0_3 = arith.constant 0 : index
    %3 = vector.load %arg2[%c0_2, %c0_3] : memref<1x128xf32, #tpu.memory_space<vmem>>, vector<1x128xf32>
    %4 = vector.broadcast %3 : vector<1x128xf32> to vector<18x128xf32>
    %5 = arith.mulf %2, %4 : vector<18x128xf32>
    %c0_4 = arith.constant 0 : index
    %c0_5 = arith.constant 0 : index
    %6 = vector.load %arg3[%c0_4, %c0_5] : memref<1x128xf32, #tpu.memory_space<vmem>>, vector<1x128xf32>
    %7 = vector.broadcast %6 : vector<1x128xf32> to vector<18x128xf32>
    %8 = arith.addf %5, %7 : vector<18x128xf32>
    %cst = arith.constant 0.000000e+00 : f32
    %9 = vector.broadcast %cst : f32 to vector<18x128xf32>
    %10 = arith.maximumf %8, %9 : vector<18x128xf32>
    %11 = vector.extract_strided_slice %10 {offsets = [0, 0], sizes = [16, 128], strides = [1, 1]} : vector<18x128xf32> to vector<16x128xf32>
    %12 = arith.truncf %11 : vector<16x128xf32> to vector<16x128xbf16>
    %c0_6 = arith.constant 0 : index
    %c0_7 = arith.constant 0 : index
    %c0_8 = arith.constant 0 : index
    %13 = vector.load %arg4[%c0_6, %c0_7, %c0_8] : memref<3x128x128xbf16, #tpu.memory_space<vmem>>, vector<1x128x128xbf16>
    %14 = vector.shape_cast %13 : vector<1x128x128xbf16> to vector<128x128xbf16>
    %cst_9 = arith.constant dense<0.000000e+00> : vector<16x128xf32>
    %15 = tpu.matmul %12, %14, %cst_9 {dimension_numbers = #tpu.dot_dimension_numbers<[1], [0], [0], [1], [0, 0, 1, 1], [], []>} : vector<16x128xbf16>, vector<128x128xbf16>, vector<16x128xf32> -> vector<16x128xf32>
    %16 = vector.extract_strided_slice %10 {offsets = [1, 0], sizes = [16, 128], strides = [1, 1]} : vector<18x128xf32> to vector<16x128xf32>
    %17 = arith.truncf %16 : vector<16x128xf32> to vector<16x128xbf16>
    %c1 = arith.constant 1 : index
    %c0_10 = arith.constant 0 : index
    %c0_11 = arith.constant 0 : index
    %18 = vector.load %arg4[%c1, %c0_10, %c0_11] : memref<3x128x128xbf16, #tpu.memory_space<vmem>>, vector<1x128x128xbf16>
    %19 = vector.shape_cast %18 : vector<1x128x128xbf16> to vector<128x128xbf16>
    %cst_12 = arith.constant dense<0.000000e+00> : vector<16x128xf32>
    %20 = tpu.matmul %17, %19, %cst_12 {dimension_numbers = #tpu.dot_dimension_numbers<[1], [0], [0], [1], [0, 0, 1, 1], [], []>} : vector<16x128xbf16>, vector<128x128xbf16>, vector<16x128xf32> -> vector<16x128xf32>
    %21 = arith.addf %15, %20 : vector<16x128xf32>
    %22 = vector.extract_strided_slice %10 {offsets = [2, 0], sizes = [16, 128], strides = [1, 1]} : vector<18x128xf32> to vector<16x128xf32>
    %23 = arith.truncf %22 : vector<16x128xf32> to vector<16x128xbf16>
    %c2 = arith.constant 2 : index
    %c0_13 = arith.constant 0 : index
    %c0_14 = arith.constant 0 : index
    %24 = vector.load %arg4[%c2, %c0_13, %c0_14] : memref<3x128x128xbf16, #tpu.memory_space<vmem>>, vector<1x128x128xbf16>
    %25 = vector.shape_cast %24 : vector<1x128x128xbf16> to vector<128x128xbf16>
    %cst_15 = arith.constant dense<0.000000e+00> : vector<16x128xf32>
    %26 = tpu.matmul %23, %25, %cst_15 {dimension_numbers = #tpu.dot_dimension_numbers<[1], [0], [0], [1], [0, 0, 1, 1], [], []>} : vector<16x128xbf16>, vector<128x128xbf16>, vector<16x128xf32> -> vector<16x128xf32>
    %27 = arith.addf %21, %26 : vector<16x128xf32>
    %cst_16 = arith.constant dense<0.000000e+00> : vector<128xf32>
    %28 = vector.multi_reduction <add>, %27, %cst_16 [0] : vector<16x128xf32> to vector<128xf32>
    %29 = vector.shape_cast %28 : vector<128xf32> to vector<1x128xf32>
    %30 = vector.shape_cast %29 : vector<1x128xf32> to vector<1x1x128xf32>
    %c0_17 = arith.constant 0 : index
    %c0_18 = arith.constant 0 : index
    %c0_19 = arith.constant 0 : index
    %31 = vector.load %arg6[%c0_17, %c0_18, %c0_19] : memref<1x1x128xf32, #tpu.memory_space<vmem>>, vector<1x1x128xf32>
    tpu.vector_store %arg6[%c0_17, %c0_18, %c0_19], %30 {strides = array<i32>} : memref<1x1x128xf32, #tpu.memory_space<vmem>>, vector<1x1x128xf32>,
    %32 = arith.mulf %27, %27 : vector<16x128xf32>
    %cst_20 = arith.constant dense<0.000000e+00> : vector<128xf32>
    %33 = vector.multi_reduction <add>, %32, %cst_20 [0] : vector<16x128xf32> to vector<128xf32>
    %34 = vector.shape_cast %33 : vector<128xf32> to vector<1x128xf32>
    %35 = vector.shape_cast %34 : vector<1x128xf32> to vector<1x1x128xf32>
    %c0_21 = arith.constant 0 : index
    %c0_22 = arith.constant 0 : index
    %c0_23 = arith.constant 0 : index
    %36 = vector.load %arg7[%c0_21, %c0_22, %c0_23] : memref<1x1x128xf32, #tpu.memory_space<vmem>>, vector<1x1x128xf32>
    tpu.vector_store %arg7[%c0_21, %c0_22, %c0_23], %35 {strides = array<i32>} : memref<1x1x128xf32, #tpu.memory_space<vmem>>, vector<1x1x128xf32>,
    %37 = arith.truncf %27 : vector<16x128xf32> to vector<16x128xbf16>
    %38 = vector.shape_cast %37 : vector<16x128xbf16> to vector<1x16x128xbf16>
    %c0_24 = arith.constant 0 : index
    %c0_25 = arith.constant 0 : index
    %c0_26 = arith.constant 0 : index
    %39 = vector.load %arg5[%c0_24, %c0_25, %c0_26] : memref<1x16x128xbf16, #tpu.memory_space<vmem>>, vector<1x16x128xbf16>
    tpu.vector_store %arg5[%c0_24, %c0_25, %c0_26], %38 {strides = array<i32>} : memref<1x16x128xbf16, #tpu.memory_space<vmem>>, vector<1x16x128xbf16>,
    return
  }
  func.func @transform_0(%arg0: i32) -> (i32, i32, i32) {
    %c0_i32 = arith.constant 0 : i32
    %c0_i32_0 = arith.constant 0 : i32
    %c0_i32_1 = arith.constant 0 : i32
    return %arg0, %c0_i32, %c0_i32_0 : i32, i32, i32
  }
  func.func @transform_1(%arg0: i32) -> (i32, i32) {
    %c0_i32 = arith.constant 0 : i32
    %c0_i32_0 = arith.constant 0 : i32
    %c0_i32_1 = arith.constant 0 : i32
    return %c0_i32, %c0_i32_0 : i32, i32
  }
  func.func @transform_2(%arg0: i32) -> (i32, i32) {
    %c0_i32 = arith.constant 0 : i32
    %c0_i32_0 = arith.constant 0 : i32
    %c0_i32_1 = arith.constant 0 : i32
    return %c0_i32, %c0_i32_0 : i32, i32
  }
  func.func @transform_3(%arg0: i32) -> (i32, i32, i32) {
    %c0_i32 = arith.constant 0 : i32
    %c0_i32_0 = arith.constant 0 : i32
    %c0_i32_1 = arith.constant 0 : i32
    %c0_i32_2 = arith.constant 0 : i32
    return %c0_i32, %c0_i32_0, %c0_i32_1 : i32, i32, i32
  }
  func.func @transform_4(%arg0: i32) -> (i32, i32, i32) {
    %c0_i32 = arith.constant 0 : i32
    %c0_i32_0 = arith.constant 0 : i32
    %c0_i32_1 = arith.constant 0 : i32
    return %arg0, %c0_i32, %c0_i32_0 : i32, i32, i32
  }
  func.func @transform_5(%arg0: i32) -> (i32, i32, i32) {
    %c0_i32 = arith.constant 0 : i32
    %c0_i32_0 = arith.constant 0 : i32
    %c0_i32_1 = arith.constant 0 : i32
    return %arg0, %c0_i32, %c0_i32_0 : i32, i32, i32
  }
  func.func @transform_6(%arg0: i32) -> (i32, i32, i32) {
    %c0_i32 = arith.constant 0 : i32
    %c0_i32_0 = arith.constant 0 : i32
    %c0_i32_1 = arith.constant 0 : i32
    return %arg0, %c0_i32, %c0_i32_0 : i32, i32, i32
  }
}

module attributes {stable_mosaic.version = 11 : i64} {
  func.func @_finalize_kernel(%arg0: i32, %arg1: memref<1x16x128xbf16, #tpu.memory_space<vmem>>, %arg2: memref<1x128xf32, #tpu.memory_space<vmem>>, %arg3: memref<1x128xf32, #tpu.memory_space<vmem>>, %arg4: memref<1x16x128xf32, #tpu.memory_space<vmem>>, %arg5: memref<1x16x128xf32, #tpu.memory_space<vmem>>) attributes {dimension_semantics = [#tpu.dimension_semantics<parallel>], iteration_bounds = array<i64: 2>, scalar_prefetch = 0 : i64, scratch_operands = 0 : i64, tpu.core_type = #tpu.core_type<tc>, window_params = [{transform_indices = @transform_0, window_bounds = array<i64: 1, 16, 128>}, {pipeline_mode = #tpu.pipeline_mode<synchronous>, transform_indices = @transform_1, window_bounds = array<i64: 1, 128>}, {pipeline_mode = #tpu.pipeline_mode<synchronous>, transform_indices = @transform_2, window_bounds = array<i64: 1, 128>}, {transform_indices = @transform_3, window_bounds = array<i64: 1, 16, 128>}, {transform_indices = @transform_4, window_bounds = array<i64: 1, 16, 128>}]} {
    %c0 = arith.constant 0 : index
    %c0_0 = arith.constant 0 : index
    %c0_1 = arith.constant 0 : index
    %0 = vector.load %arg1[%c0, %c0_0, %c0_1] : memref<1x16x128xbf16, #tpu.memory_space<vmem>>, vector<1x16x128xbf16>
    %1 = arith.extf %0 : vector<1x16x128xbf16> to vector<1x16x128xf32>
    %c0_2 = arith.constant 0 : index
    %c0_3 = arith.constant 0 : index
    %2 = vector.load %arg2[%c0_2, %c0_3] : memref<1x128xf32, #tpu.memory_space<vmem>>, vector<1x128xf32>
    %3 = vector.shape_cast %2 : vector<1x128xf32> to vector<1x1x128xf32>
    %4 = vector.broadcast %3 : vector<1x1x128xf32> to vector<1x16x128xf32>
    %5 = arith.mulf %1, %4 : vector<1x16x128xf32>
    %c0_4 = arith.constant 0 : index
    %c0_5 = arith.constant 0 : index
    %6 = vector.load %arg3[%c0_4, %c0_5] : memref<1x128xf32, #tpu.memory_space<vmem>>, vector<1x128xf32>
    %7 = vector.shape_cast %6 : vector<1x128xf32> to vector<1x1x128xf32>
    %8 = vector.broadcast %7 : vector<1x1x128xf32> to vector<1x16x128xf32>
    %9 = arith.addf %5, %8 : vector<1x16x128xf32>
    %c0_6 = arith.constant 0 : index
    %c0_7 = arith.constant 0 : index
    %c0_8 = arith.constant 0 : index
    %10 = vector.load %arg4[%c0_6, %c0_7, %c0_8] : memref<1x16x128xf32, #tpu.memory_space<vmem>>, vector<1x16x128xf32>
    %11 = arith.addf %9, %10 : vector<1x16x128xf32>
    %c0_9 = arith.constant 0 : index
    %c0_10 = arith.constant 0 : index
    %c0_11 = arith.constant 0 : index
    %12 = vector.load %arg5[%c0_9, %c0_10, %c0_11] : memref<1x16x128xf32, #tpu.memory_space<vmem>>, vector<1x16x128xf32>
    tpu.vector_store %arg5[%c0_9, %c0_10, %c0_11], %11 {strides = array<i32>} : memref<1x16x128xf32, #tpu.memory_space<vmem>>, vector<1x16x128xf32>,
    return
  }
  func.func @transform_0(%arg0: i32) -> (i32, i32, i32) {
    %c0_i32 = arith.constant 0 : i32
    %c0_i32_0 = arith.constant 0 : i32
    %c0_i32_1 = arith.constant 0 : i32
    return %arg0, %c0_i32, %c0_i32_0 : i32, i32, i32
  }
  func.func @transform_1(%arg0: i32) -> (i32, i32) {
    %c0_i32 = arith.constant 0 : i32
    %c0_i32_0 = arith.constant 0 : i32
    %c0_i32_1 = arith.constant 0 : i32
    return %c0_i32, %c0_i32_0 : i32, i32
  }
  func.func @transform_2(%arg0: i32) -> (i32, i32) {
    %c0_i32 = arith.constant 0 : i32
    %c0_i32_0 = arith.constant 0 : i32
    %c0_i32_1 = arith.constant 0 : i32
    return %c0_i32, %c0_i32_0 : i32, i32
  }
  func.func @transform_3(%arg0: i32) -> (i32, i32, i32) {
    %c0_i32 = arith.constant 0 : i32
    %c0_i32_0 = arith.constant 0 : i32
    %c0_i32_1 = arith.constant 0 : i32
    return %arg0, %c0_i32, %c0_i32_0 : i32, i32, i32
  }
  func.func @transform_4(%arg0: i32) -> (i32, i32, i32) {
    %c0_i32 = arith.constant 0 : i32
    %c0_i32_0 = arith.constant 0 : i32
    %c0_i32_1 = arith.constant 0 : i32
    return %arg0, %c0_i32, %c0_i32_0 : i32, i32, i32
  }
}

</mosaic_0001>

<bundles_post_ra>
// kernel: tile.23
= control target key start
LH: loop header
LB: loop body
LE: loop exit
PB: predicated region body
PF: predicated region fallthrough
CT: control target
= control target key end

     0   :  { %s28_s0 = inlined_call_operand.vmem [shape: f32[8], index: 0, kind: input, shape index: {}]   ;;  %s29_s1 = inlined_call_operand.vmem [shape: f32[16,8], index: 1, kind: output, shape index: {}]  }
   0x1   :  { %v4_v0 = vld [vmem:[%s28_s0] ss:$0 sm:$0xff] }
   0x2   :  { %5 = vst [vmem:[%s29_s1] sm:$0xff] %v4_v0 }
   0x3   :  { %8 = vst [vmem:[%s29_s1 + $0x8] sm:$0xff] %v4_v0 }

// kernel: tile.24
= control target key start
LH: loop header
LB: loop body
LE: loop exit
PB: predicated region body
PF: predicated region fallthrough
CT: control target
= control target key end

     0   :  { %s131_s10 = smov 120   ;;  %s132_s11 = smov 104   ;;  %vm3_vm0 = vcmask 64512   ;;  %vm9_vm1 = vcmask 1048512   ;;  %vm15_vm2 = vcmask 982912   ;;  %vm21_vm3 = vcmask 917312   ;;  %s207_s0 = inlined_call_operand.vmem [shape: f32[16,8], index: 0, kind: input, shape index: {}]   ;;  %s208_s1 = inlined_call_operand.vmem [shape: f32[1,128], index: 1, kind: output, shape index: {}]  }
   0x1   :  { %v101_v0 = vld [vmem:[%s207_s0 + $0xf] sm:$0x1]   ;;  %v103_v1 = vld [vmem:[%s207_s0 + $0xd] sm:$0x1]   ;;  %v105_v2 = vld [vmem:[%s207_s0 + $0xb] sm:$0x1]  }
   0x2   :  { %7 = vrot.lane.b32.xlu0 %v101_v0, %s131_s10  ;;  %19 = vrot.lane.b32.xlu1 %v103_v1, %s132_s11  ;;  %s133_s14 = smov 88   ;;  %v102_v3 = vld [vmem:[%s207_s0 + $0xe] sm:$0x1]   ;;  %v104_v4 = vld [vmem:[%s207_s0 + $0xc] sm:$0x1]   ;;  %s134_s19 = smov 112  }
   0x3   :  { %31 = vrot.lane.b32.xlu2 %v105_v2, %s133_s14  ;;  %s135_s20 = smov 96   ;;  %v106_v5 = vld [vmem:[%s207_s0 + $0xa] sm:$0x1]   ;;  %s136_s23 = smov 80   ;;  %v107_v6 = vld [vmem:[%s207_s0 + $0x9] sm:$0x1]  }
   0x4   :  { %v108_v7 = vld [vmem:[%s207_s0 + $0x8] sm:$0x1]   ;;  %s137_s28 = smov 72   ;;  %s138_s29 = smov 64   ;;  %v109_v8 = vld [vmem:[%s207_s0 + $0x7] sm:$0x1]  }
   0x5   :  { %s139_s3 = smov 56   ;;  %v110_v9 = vld [vmem:[%s207_s0 + $0x6] sm:$0x1]   ;;  %v111_v10 = vld [vmem:[%s207_s0 + $0x5] sm:$0x1]   ;;  %s140_s8 = smov 48  }
   0x6   :  { %s141_s9 = smov 40   ;;  %v112_v11 = vld [vmem:[%s207_s0 + $0x4] sm:$0x1]   ;;  %s142_s12 = smov 32   ;;  %v113_v12 = vld [vmem:[%s207_s0 + $0x3] sm:$0x1]  }
   0x7   :  { %v114_v13 = vld [vmem:[%s207_s0 + $0x2] sm:$0x1]   ;;  %s143_s17 = smov 24   ;;  %s144_s18 = smov 16   ;;  %v115_v14 = vld [vmem:[%s207_s0 + $0x1] sm:$0x1]  }
   0x8   :  { %s145_s21 = smov 8   ;;  %v2_v15 = vld [vmem:[%s207_s0] sm:$0x1]   ;;  %vm27_vm4 = vcmask 851712   ;;  %vm33_vm5 = vcmask 786112   ;;  %vm39_vm6 = vcmask 720512  }
   0x9   :  { %4 = vst.msk [vmem:[#allocation0] sm:$0x1] %vm3_vm0, %v2_v15   ;;  %vm45_vm7 = vcmask 654912   ;;  %vm51_vm8 = vcmask 589312   ;;  %vm57_vm9 = vcmask 523712   ;;  %vm63_vm10 = vcmask 458112  }
   0xa   :  { %13 = vrot.lane.b32.xlu0 %v102_v3, %s134_s19  ;;  %25 = vrot.lane.b32.xlu1 %v104_v4, %s135_s20  ;;  %vm69_vm11 = vcmask 392512   ;;  %vm75_vm12 = vcmask 326912   ;;  %vm81_vm13 = vcmask 261312   ;;  %vm87_vm14 = vcmask 195712  }
   0xb   :  { %37 = vrot.lane.b32.xlu2 %v106_v5, %s136_s23  ;;  %vm93_vm15 = vcmask 130112  }
  0x12   :  { %43 = vrot.lane.b32.xlu0 %v107_v6, %s137_s28  ;;  %49 = vrot.lane.b32.xlu1 %v108_v7, %s138_s29 }
  0x13   :  { %55 = vrot.lane.b32.xlu2 %v109_v8, %s139_s3 }
  0x1a   :  { %61 = vrot.lane.b32.xlu0 %v110_v9, %s140_s8  ;;  %67 = vrot.lane.b32.xlu1 %v111_v10, %s141_s9 }
  0x1b   :  { %73 = vrot.lane.b32.xlu2 %v112_v11, %s142_s12 }
  0x22   :  { %79 = vrot.lane.b32.xlu0 %v113_v12, %s143_s17  ;;  %85 = vrot.lane.b32.xlu1 %v114_v13, %s144_s18 }
  0x23   :  { %91 = vrot.lane.b32.xlu2 %v115_v14, %s145_s21 }
  0x5d   :  { %v32_v16 = vpop.permute.xlu2 %31  }
  0x65   :  { %v38_v17 = vpop.permute.xlu2 %37  }
  0x6d   :  { %v56_v18 = vpop.permute.xlu2 %55  }
  0x74   :  { %v8_v19 = vpop.permute.xlu0 %7   ;;  %v20_v20 = vpop.permute.xlu1 %19  }
  0x75   :  { %10 = vst.msk [vmem:[#allocation0] sm:$0x1] %vm9_vm1, %v8_v19   ;;  %v74_v21 = vpop.permute.xlu2 %73  }
  0x7c   :  { %v14_v22 = vpop.permute.xlu0 %13   ;;  %v26_v23 = vpop.permute.xlu1 %25  }
  0x7d   :  { %16 = vst.msk [vmem:[#allocation0] sm:$0x1] %vm15_vm2, %v14_v22   ;;  %v92_v24 = vpop.permute.xlu2 %91  }
  0x7e   :  { %22 = vst.msk [vmem:[#allocation0] sm:$0x1] %vm21_vm3, %v20_v20  }
  0x7f   :  { %28 = vst.msk [vmem:[#allocation0] sm:$0x1] %vm27_vm4, %v26_v23  }
  0x80   :  { %34 = vst.msk [vmem:[#allocation0] sm:$0x1] %vm33_vm5, %v32_v16  }
  0x81   :  { %40 = vst.msk [vmem:[#allocation0] sm:$0x1] %vm39_vm6, %v38_v17  }
  0x84   :  { %v44_v25 = vpop.permute.xlu0 %43   ;;  %v50_v26 = vpop.permute.xlu1 %49  }
  0x85   :  { %46 = vst.msk [vmem:[#allocation0] sm:$0x1] %vm45_vm7, %v44_v25  }
  0x86   :  { %52 = vst.msk [vmem:[#allocation0] sm:$0x1] %vm51_vm8, %v50_v26  }
  0x87   :  { %58 = vst.msk [vmem:[#allocation0] sm:$0x1] %vm57_vm9, %v56_v18  }
  0x8c   :  { %v62_v27 = vpop.permute.xlu0 %61   ;;  %v68_v28 = vpop.permute.xlu1 %67  }
  0x8d   :  { %64 = vst.msk [vmem:[#allocation0] sm:$0x1] %vm63_vm10, %v62_v27  }
  0x8e   :  { %70 = vst.msk [vmem:[#allocation0] sm:$0x1] %vm69_vm11, %v68_v28  }
  0x8f   :  { %76 = vst.msk [vmem:[#allocation0] sm:$0x1] %vm75_vm12, %v74_v21  }
  0x94   :  { %v80_v29 = vpop.permute.xlu0 %79   ;;  %v86_v30 = vpop.permute.xlu1 %85  }
  0x95   :  { %82 = vst.msk [vmem:[#allocation0] sm:$0x1] %vm81_vm13, %v80_v29  }
  0x96   :  { %88 = vst.msk [vmem:[#allocation0] sm:$0x1] %vm87_vm14, %v86_v30  }
  0x97   :  { %94 = vst.msk [vmem:[#allocation0] sm:$0x1] %vm93_vm15, %v92_v24  }
  0x9e   :  { %v97_v31 = vld [vmem:[#allocation0] sm:$0x1] }
  0x9f   :  { %100 = vst [vmem:[%s208_s1] sm:$0x1] %v97_v31 }

// kernel: resnet_block_forward.3
= control target key start
LH: loop header
LB: loop body
LE: loop exit
PB: predicated region body
PF: predicated region fallthrough
CT: control target
= control target key end

     0   :  { %s846_s15 = smov 0   ;;  %s953_s0 = inlined_call_operand.vmem [shape: f32[2,16,128], index: 0, kind: input, shape index: {}]   ;;  %s954_s1 = inlined_call_operand.vmem [shape: bf16[3,128,128], index: 1, kind: input, shape index: {}]   ;;  %s955_s2 = inlined_call_operand.vmem [shape: bf16[2,18,128], index: 2, kind: output, shape index: {0}]   ;;  %s956_s3 = inlined_call_operand.vmem [shape: f32[2,1,128], index: 3, kind: output, shape index: {1}]   ;;  %s957_s4 = inlined_call_operand.vmem [shape: f32[2,1,128], index: 4, kind: output, shape index: {2}]  }
   0x1 LB: > { %s636_s16 = sadd.s32 4294967295, %s819_s15   ;;  %p640_p0 = scmp.ge.s32.totalorder %s819_s15, 1  ;;  %s819_s15 = sphi %s846_s15, %s15_s15  }
   0x2   : > { %p167_p1 = scmp.lt.s32.totalorder %s819_s15, 3 }
   0x4   : > { %p168_p2 = pnand %p640_p0, %p167_p1 }
   0x5   : > { %p199_p3 = scmp.lt.s32.totalorder (!%p168_p2), %s636_s16, 1 }
   0x6   : > { %171 = sbr.rel (%p168_p2) target bundleno = 204 (0xcc), region = 28 }
   0xb   : > { %v790_v0 = vld [vmem:[%s954_s1 + $0x78] sm:$0xff]  ;;  %v789_v3 = vld [vmem:[%s954_s1 + $0x70] sm:$0xff]  ;;  %s959_s16 = smov (!%p199_p3, %s636_s16), 1  ;;  %v788_v6 = vld [vmem:[%s954_s1 + $0x68] sm:$0xff]  ;;  %vm221_vm0 = vcmask 1040384   ;;  %vm424_vm2 = vcmask 1046528  }
   0xc   : > { %v782_v1 = vld [vmem:[%s954_s1 + $0x38] sm:$0xff]  ;;  %329 = vmatpush.bf16.msra.mxu0 %v790_v0  ;;  %v781_v4 = vld [vmem:[%s954_s1 + $0x30] sm:$0xff]  ;;  %s774_s29 = sshll.u32 %s959_s16, 4  ;;  %v780_v7 = vld [vmem:[%s954_s1 + $0x28] sm:$0xff]  ;;  %vm267_vm1 = vsmask.f32 7424  ;;  %s211_s27 = scalar_lea.vmem %s956_s3, %s959_s16 }
   0xd   : > { %v798_v2 = vld [vmem:[%s954_s1 + $0xb8] sm:$0xff]  ;;  %391 = vmatpush.bf16.msra.mxu1 %v782_v1  ;;  %v797_v5 = vld [vmem:[%s954_s1 + $0xb0] sm:$0xff]  ;;  %s203_s6 = scalar_lea.vmem %s953_s0, %s774_s29  ;;  %v796_v8 = vld [vmem:[%s954_s1 + $0xa8] sm:$0xff]  ;;  %s804_s21 = smul.u32 12, %s959_s16 }
   0xe   : > { %477 = vmatpush.bf16.msra.mxu2 %v798_v2  ;;  %v215_v9 = vld [vmem:[%s203_s6] sm:$0xff]  ;;  %v216_v10 = vld [vmem:[%s203_s6 + $0x8] sm:$0xff]  ;;  %v786_v20 = vld [vmem:[%s954_s1 + $0x58] sm:$0xff]  ;;  %s214_s30 = scalar_lea.vmem %s957_s4, %s959_s16 }
   0xf   : > { %v218_v11 = vrot.slane %v215_v9, 1  ;;  %v222_v12 = vrot.slane %v215_v9, 7  ;;  %v223_v13 = vrot.slane %v216_v10, 7  ;;  %v787_v14 = vld [vmem:[%s954_s1 + $0x60] sm:$0xff]  ;;  %v228_v18 = vrot.slane %v216_v10, 5  ;;  %v778_v21 = vld [vmem:[%s954_s1 + $0x18] sm:$0xff]  ;;  %s208_s24 = scalar_lea.vmem %s955_s2, %s804_s21 }
  0x10   : > { %330 = vmatpush.bf16.msra.mxu0 %v789_v3  ;;  %v779_v15 = vld [vmem:[%s954_s1 + $0x20] sm:$0xff]  ;;  %v794_v23 = vld [vmem:[%s954_s1 + $0x98] sm:$0xff]  ;;  %v785_v25 = vld [vmem:[%s954_s1 + $0x50] sm:$0xff] }
  0x11   : > { %392 = vmatpush.bf16.msra.mxu1 %v781_v4  ;;  %v795_v16 = vld [vmem:[%s954_s1 + $0xa0] sm:$0xff]  ;;  %v224_v17 = vsel %vm221_vm0, %v222_v12, %v223_v13  ;;  %v230_v19 = vsel %vm221_vm0, %v218_v11, %v222_v12  ;;  %v231_v24 = vsel %vm221_vm0, %v223_v13, %v228_v18  ;;  %v777_v26 = vld [vmem:[%s954_s1 + $0x10] sm:$0xff]  ;;  %v784_v30 = vld [vmem:[%s954_s1 + $0x48] sm:$0xff] }
  0x12   : > { %478 = vmatpush.bf16.msra.mxu2 %v797_v5  ;;  %v232_v22 = vpack.c.bf16 %v224_v17, %v230_v19  ;;  %v249_v27 = vpack.c.bf16 %v231_v24, %v231_v24  ;;  %v793_v29 = vld [vmem:[%s954_s1 + $0x90] sm:$0xff]  ;;  %v776_v31 = vld [vmem:[%s954_s1 + $0x8] sm:$0xff]  ;;  %v783_v36 = vld [vmem:[%s954_s1 + $0x40] sm:$0xff] }
  0x13   : > { %v792_v35 = vld [vmem:[%s954_s1 + $0x88] sm:$0xff]  ;;  %v775_v37 = vld [vmem:[%s954_s1] sm:$0xff] }
  0x14   : > { %331 = vmatpush.bf16.msra.mxu0 %v788_v6  ;;  %v271_v28 = vshll.u32 %v232_v22, 16  ;;  %v269_v32 = vshrl.u32 %v232_v22, 16  ;;  %v276_v34 = vshll.u32 %v249_v27, 16  ;;  %v791_v40 = vld [vmem:[%s954_s1 + $0x80] sm:$0xff]  ;;  %v425_v41 = vrot.slane %v232_v22, 1 }
  0x15   : > { %393 = vmatpush.bf16.msra.mxu1 %v780_v7  ;;  %v426_v42 = vrot.slane %v249_v27, 1 }
  0x16   : > { %479 = vmatpush.bf16.msra.mxu2 %v796_v8  ;;  %v273_v33 = vrot.slane %v271_v28, 1  ;;  %v278_v39 = vrot.slane %v276_v34, 1 }
  0x17   : > { %v427_v44 = vsel %vm424_vm2, %v425_v41, %v426_v42 }
  0x18   : > { %332 = vmatpush.bf16.msra.mxu0 %v787_v14  ;;  %v274_v38 = vor.u32 %v273_v33, %v269_v32 }
  0x19   : > { %394 = vmatpush.bf16.msra.mxu1 %v779_v15 }
  0x1a   : > { %480 = vmatpush.bf16.msra.mxu2 %v795_v16  ;;  %v279_v43 = vsel %vm267_vm1, %v274_v38, %v278_v39 }
  0x1c   : > { %333 = vmatpush.bf16.msra.mxu0 %v786_v20 }
  0x1d   : > { %395 = vmatpush.bf16.msra.mxu1 %v778_v21 }
  0x1e   : > { %481 = vmatpush.bf16.msra.mxu2 %v794_v23 }
  0x20   : > { %334 = vmatpush.bf16.msra.mxu0 %v785_v25 }
  0x21   : > { %396 = vmatpush.bf16.msra.mxu1 %v777_v26 }
  0x22   : > { %482 = vmatpush.bf16.msra.mxu2 %v793_v29 }
  0x24   : > { %335 = vmatpush.bf16.msra.mxu0 %v784_v30 }
  0x25   : > { %397 = vmatpush.bf16.msra.mxu1 %v776_v31 }
  0x26   : > { %483 = vmatpush.bf16.msra.mxu2 %v792_v35 }
  0x28   : > { %336 = vmatpush.bf16.msra.mxu0 %v783_v36 }
  0x29   : > { %398 = vmatpush.bf16.msra.mxu1 %v775_v37 }
  0x2a   : > { %484 = vmatpush.bf16.msra.mxu2 %v791_v40 }
  0x2b   : > { %337 = vmatmul.bf16.vlgmr.msra.gmra.mxu0 %v279_v43 }
  0x2c   : > { %399 = vmatmul.bf16.vlgmr.msra.gmra.mxu1 %v232_v22 }
  0x2d   : > { %485 = vmatmul.bf16.vlgmr.msra.gmra.mxu2 %v427_v44 }
  0xa8   : > { %v338_v45 = vpop.f32.mrf.mxu0 }
  0xa9   : > { %v400_v46 = vpop.f32.mrf.mxu1 }
  0xaa   : > { %v401_v47 = vadd.f32 %v400_v46, %v338_v45 }
  0xb0   : > { %v486_v48 = vpop.f32.mrf.mxu2  ;;  %v340_v50 = vpop.f32.mrf.mxu0 }
  0xb1   : > { %v491_v49 = vadd.f32 %v486_v48, %v401_v47  ;;  %v402_v51 = vpop.f32.mrf.mxu1 }
  0xb2   : > { %v403_v52 = vadd.f32 %v402_v51, %v340_v50 }
  0xb3   : > { %v512_v53 = vrot.slane %v491_v49, 1  ;;  %v515_v54 = vrot.slane %v491_v49, 7  ;;  %v501_v57 = vmul.f32 %v491_v49, %v491_v49 }
  0xb5   : > { %v523_v62 = vsel %vm221_vm0, %v512_v53, %v515_v54 }
  0xb8   : > { %v488_v55 = vpop.f32.mrf.mxu2 }
  0xb9   : > { %v492_v56 = vadd.f32 %v488_v55, %v403_v52 }
  0xbb   : > { %v493_v58 = vadd.f32 %v492_v56, %v491_v49  ;;  %v502_v59 = vmul.f32 %v492_v56, %v492_v56  ;;  %v516_v60 = vrot.slane %v492_v56, 7  ;;  %v521_v61 = vrot.slane %v492_v56, 5 }
  0xbd   : > { %v494_v63 = vrot.slane %v493_v58, 4  ;;  %v503_v0 = vadd.f32 %v502_v59, %v501_v57  ;;  %v517_v1 = vsel %vm221_vm0, %v515_v54, %v516_v60  ;;  %v524_v2 = vsel %vm221_vm0, %v516_v60, %v521_v61 }
  0xbe   : > { %v527_v3 = vpack.c.bf16 %v524_v2, %v524_v2  ;;  %v802_v4 = vpack.c.bf16 %v517_v1, %v523_v62 }
  0xbf   : > { %v495_v5 = vadd.f32 %v494_v63, %v493_v58  ;;  %v504_v6 = vrot.slane %v503_v0, 4 }
  0xc0   : > { %803 = vst [vmem:[%s208_s24] sm:$0xff] %v802_v4  }
  0xc1   : > { %v496_v7 = vrot.slane %v495_v5, 2  ;;  %v505_v8 = vadd.f32 %v504_v6, %v503_v0  ;;  %530 = vst [vmem:[%s208_s24 + $0x8] sm:$0x1] %v527_v3 }
  0xc3   : > { %v497_v9 = vadd.f32 %v496_v7, %v495_v5  ;;  %v506_v10 = vrot.slane %v505_v8, 2 }
  0xc5   : > { %v498_v11 = vrot.slane %v497_v9, 1  ;;  %v507_v12 = vadd.f32 %v506_v10, %v505_v8 }
  0xc7   : > { %v499_v13 = vadd.f32 %v498_v11, %v497_v9  ;;  %v508_v14 = vrot.slane %v507_v12, 1 }
  0xc9   : > { %500 = vst [vmem:[%s211_s27] sm:$0x1] %v499_v13  ;;  %v509_v15 = vadd.f32 %v508_v14, %v507_v12 }
  0xcb   : > { %510 = vst [vmem:[%s214_s30] sm:$0x1] %v509_v15 }
  0xcc PF: > { %s15_s15 = sadd.s32 1, %s819_s15  }
  0xcd   : > { %p12_p4 = scmp.ge.s32.totalorder %s15_s15, 4  }
  0xcf   :  { %14 = sbr.rel (!%p12_p4) target bundleno = 1 (0x1), region = 84 }

// kernel: resnet_block_forward.4
= control target key start
LH: loop header
LB: loop body
LE: loop exit
PB: predicated region body
PF: predicated region fallthrough
CT: control target
= control target key end

     0   :  { %s906_s21 = smov 0   ;;  %s1013_s0 = inlined_call_operand.vmem [shape: bf16[2,18,128], index: 0, kind: input, shape index: {}]   ;;  %s1014_s1 = inlined_call_operand.vmem [shape: f32[1,128], index: 1, kind: input, shape index: {}]   ;;  %s1015_s2 = inlined_call_operand.vmem [shape: f32[1,128], index: 2, kind: input, shape index: {}]   ;;  %s1016_s3 = inlined_call_operand.vmem [shape: bf16[3,128,128], index: 3, kind: input, shape index: {}]   ;;  %s1017_s4 = inlined_call_operand.vmem [shape: bf16[2,16,128], index: 4, kind: output, shape index: {0}]   ;;  %s1018_s5 = inlined_call_operand.vmem [shape: f32[2,1,128], index: 5, kind: output, shape index: {1}]   ;;  %s1019_s6 = inlined_call_operand.vmem [shape: f32[2,1,128], index: 6, kind: output, shape index: {2}]  }
   0x1 LB: > { %s680_s22 = sadd.s32 4294967295, %s869_s21   ;;  %p684_p0 = scmp.ge.s32.totalorder %s869_s21, 1  ;;  %s869_s21 = sphi %s906_s21, %s17_s21  }
   0x2   : > { %p217_p1 = scmp.lt.s32.totalorder %s869_s21, 3 }
   0x4   : > { %p218_p2 = pnand %p684_p0, %p217_p1 }
   0x5   : > { %p253_p3 = scmp.lt.s32.totalorder (!%p218_p2), %s680_s22, 1 }
   0x6   : > { %221 = sbr.rel (%p218_p2) target bundleno = 204 (0xcc), region = 36 }
   0xb   : > { %v834_v0 = vld [vmem:[%s1016_s3 + $0x78] sm:$0xff]  ;;  %v833_v3 = vld [vmem:[%s1016_s3 + $0x70] sm:$0xff]  ;;  %s1021_s22 = smov (!%p253_p3, %s680_s22), 1  ;;  %v832_v6 = vld [vmem:[%s1016_s3 + $0x68] sm:$0xff]  ;;  %vm327_vm0 = vsmask.f32 7424 }
   0xc   : > { %v826_v1 = vld [vmem:[%s1016_s3 + $0x38] sm:$0xff]  ;;  %389 = vmatpush.bf16.msra.mxu0 %v834_v0  ;;  %v825_v4 = vld [vmem:[%s1016_s3 + $0x30] sm:$0xff]  ;;  %s852_s11 = smul.u32 12, %s1021_s22  ;;  %v824_v7 = vld [vmem:[%s1016_s3 + $0x28] sm:$0xff]  ;;  %vm484_vm1 = vcmask 1046528   ;;  %s265_s17 = scalar_lea.vmem %s1018_s5, %s1021_s22 }
   0xd   : > { %v842_v2 = vld [vmem:[%s1016_s3 + $0xb8] sm:$0xff]  ;;  %451 = vmatpush.bf16.msra.mxu1 %v826_v1  ;;  %v841_v5 = vld [vmem:[%s1016_s3 + $0xb0] sm:$0xff]  ;;  %v840_v8 = vld [vmem:[%s1016_s3 + $0xa8] sm:$0xff]  ;;  %s268_s20 = scalar_lea.vmem %s1019_s6, %s1021_s22 }
   0xe   : > { %537 = vmatpush.bf16.msra.mxu2 %v842_v2  ;;  %s257_s18 = scalar_lea.vmem %s1013_s0, %s852_s11  ;;  %v861_v14 = vld [vmem:[%s1014_s1] ss:$0 sm:$0xff]  ;;  %v830_v25 = vld [vmem:[%s1016_s3 + $0x58] sm:$0xff]  ;;  %v829_v32 = vld [vmem:[%s1016_s3 + $0x50] sm:$0xff]  ;;  %s818_s11 = sshll.u32 %s1021_s22, 3 }
   0xf   : > { %v844_v9 = vld [vmem:[%s257_s18] sm:$0xff]   ;;  %v271_v10 = vld [vmem:[%s257_s18 + $0x8] sm:$0x1]  ;;  %v822_v26 = vld [vmem:[%s1016_s3 + $0x18] sm:$0xff]  ;;  %s262_s14 = scalar_lea.vmem %s1017_s4, %s818_s11 }
  0x10   : > { %390 = vmatpush.bf16.msra.mxu0 %v833_v3  ;;  %v845_v11 = vunpack.c.l.bf16 %v844_v9  ;;  %v846_v12 = vunpack.c.h.bf16 %v844_v9  ;;  %v274_v13 = vunpack.c.l.bf16 %v271_v10  ;;  %v862_v15 = vld [vmem:[%s1015_s2] ss:$0 sm:$0xff]  ;;  %v838_v27 = vld [vmem:[%s1016_s3 + $0x98] sm:$0xff]  ;;  %v821_v33 = vld [vmem:[%s1016_s3 + $0x10] sm:$0xff] }
  0x11   : > { %452 = vmatpush.bf16.msra.mxu1 %v825_v4  ;;  %v831_v16 = vld [vmem:[%s1016_s3 + $0x60] sm:$0xff]  ;;  %v837_v35 = vld [vmem:[%s1016_s3 + $0x90] sm:$0xff]  ;;  %v828_v37 = vld [vmem:[%s1016_s3 + $0x48] sm:$0xff] }
  0x12   : > { %538 = vmatpush.bf16.msra.mxu2 %v841_v5  ;;  %v823_v17 = vld [vmem:[%s1016_s3 + $0x20] sm:$0xff]  ;;  %v279_v19 = vmul.f32 %v861_v14, %v845_v11  ;;  %v280_v20 = vmul.f32 %v861_v14, %v846_v12  ;;  %v281_v21 = vmul.f32 %v861_v14, %v274_v13  ;;  %v820_v38 = vld [vmem:[%s1016_s3 + $0x8] sm:$0xff] }
  0x13   : > { %v839_v18 = vld [vmem:[%s1016_s3 + $0xa0] sm:$0xff]  ;;  %v836_v42 = vld [vmem:[%s1016_s3 + $0x88] sm:$0xff] }
  0x14   : > { %391 = vmatpush.bf16.msra.mxu0 %v832_v6  ;;  %v286_v22 = vadd.f32 %v862_v15, %v279_v19  ;;  %v287_v23 = vadd.f32 %v862_v15, %v280_v20  ;;  %v288_v24 = vadd.f32 %v862_v15, %v281_v21  ;;  %v827_v43 = vld [vmem:[%s1016_s3 + $0x40] sm:$0xff] }
  0x15   : > { %453 = vmatpush.bf16.msra.mxu1 %v824_v7  ;;  %v819_v44 = vld [vmem:[%s1016_s3] sm:$0xff] }
  0x16   : > { %539 = vmatpush.bf16.msra.mxu2 %v840_v8  ;;  %v289_v28 = vmax.f32 %v286_v22, 0.0  ;;  %v290_v29 = vmax.f32 %v287_v23, 0.0  ;;  %v291_v30 = vmax.f32 %v288_v24, 0.0  ;;  %v835_v47 = vld [vmem:[%s1016_s3 + $0x80] sm:$0xff] }
  0x18   : > { %392 = vmatpush.bf16.msra.mxu0 %v831_v16  ;;  %v292_v31 = vpack.c.bf16 %v290_v29, %v289_v28  ;;  %v309_v34 = vpack.c.bf16 %v291_v30, %v291_v30 }
  0x19   : > { %454 = vmatpush.bf16.msra.mxu1 %v823_v17 }
  0x1a   : > { %540 = vmatpush.bf16.msra.mxu2 %v839_v18  ;;  %v331_v36 = vshll.u32 %v292_v31, 16  ;;  %v329_v39 = vshrl.u32 %v292_v31, 16  ;;  %v336_v41 = vshll.u32 %v309_v34, 16  ;;  %v485_v48 = vrot.slane %v292_v31, 1 }
  0x1b   : > { %v486_v49 = vrot.slane %v309_v34, 1 }
  0x1c   : > { %393 = vmatpush.bf16.msra.mxu0 %v830_v25  ;;  %v333_v40 = vrot.slane %v331_v36, 1  ;;  %v338_v46 = vrot.slane %v336_v41, 1 }
  0x1d   : > { %455 = vmatpush.bf16.msra.mxu1 %v822_v26  ;;  %v487_v51 = vsel %vm484_vm1, %v485_v48, %v486_v49 }
  0x1e   : > { %541 = vmatpush.bf16.msra.mxu2 %v838_v27  ;;  %v334_v45 = vor.u32 %v333_v40, %v329_v39 }
  0x20   : > { %394 = vmatpush.bf16.msra.mxu0 %v829_v32  ;;  %v339_v50 = vsel %vm327_vm0, %v334_v45, %v338_v46 }
  0x21   : > { %456 = vmatpush.bf16.msra.mxu1 %v821_v33 }
  0x22   : > { %542 = vmatpush.bf16.msra.mxu2 %v837_v35 }
  0x24   : > { %395 = vmatpush.bf16.msra.mxu0 %v828_v37 }
  0x25   : > { %457 = vmatpush.bf16.msra.mxu1 %v820_v38 }
  0x26   : > { %543 = vmatpush.bf16.msra.mxu2 %v836_v42 }
  0x28   : > { %396 = vmatpush.bf16.msra.mxu0 %v827_v43 }
  0x29   : > { %458 = vmatpush.bf16.msra.mxu1 %v819_v44 }
  0x2a   : > { %544 = vmatpush.bf16.msra.mxu2 %v835_v47 }
  0x2b   : > { %397 = vmatmul.bf16.vlgmr.msra.gmra.mxu0 %v339_v50 }
  0x2c   : > { %459 = vmatmul.bf16.vlgmr.msra.gmra.mxu1 %v292_v31 }
  0x2d   : > { %545 = vmatmul.bf16.vlgmr.msra.gmra.mxu2 %v487_v51 }
  0xa8   : > { %v398_v52 = vpop.f32.mrf.mxu0 }
  0xa9   : > { %v460_v53 = vpop.f32.mrf.mxu1 }
  0xaa   : > { %v461_v55 = vadd.f32 %v460_v53, %v398_v52 }
  0xb0   : > { %v546_v54 = vpop.f32.mrf.mxu2  ;;  %v400_v56 = vpop.f32.mrf.mxu0 }
  0xb1   : > { %v462_v57 = vpop.f32.mrf.mxu1  ;;  %v551_v58 = vadd.f32 %v546_v54, %v461_v55 }
  0xb2   : > { %v463_v59 = vadd.f32 %v462_v57, %v400_v56 }
  0xb3   : > { %v561_v62 = vmul.f32 %v551_v58, %v551_v58 }
  0xb8   : > { %v548_v60 = vpop.f32.mrf.mxu2 }
  0xb9   : > { %v552_v61 = vadd.f32 %v548_v60, %v463_v59 }
  0xbb   : > { %v553_v63 = vadd.f32 %v552_v61, %v551_v58  ;;  %v562_v0 = vmul.f32 %v552_v61, %v552_v61  ;;  %v850_v1 = vpack.c.bf16 %v552_v61, %v551_v58 }
  0xbd   : > { %v554_v2 = vrot.slane %v553_v63, 4  ;;  %v563_v3 = vadd.f32 %v562_v0, %v561_v62  ;;  %851 = vst [vmem:[%s262_s14] sm:$0xff] %v850_v1  }
  0xbf   : > { %v555_v4 = vadd.f32 %v554_v2, %v553_v63  ;;  %v564_v5 = vrot.slane %v563_v3, 4 }
  0xc1   : > { %v556_v6 = vrot.slane %v555_v4, 2  ;;  %v565_v7 = vadd.f32 %v564_v5, %v563_v3 }
  0xc3   : > { %v557_v8 = vadd.f32 %v556_v6, %v555_v4  ;;  %v566_v9 = vrot.slane %v565_v7, 2 }
  0xc5   : > { %v558_v10 = vrot.slane %v557_v8, 1  ;;  %v567_v11 = vadd.f32 %v566_v9, %v565_v7 }
  0xc7   : > { %v559_v12 = vadd.f32 %v558_v10, %v557_v8  ;;  %v568_v13 = vrot.slane %v567_v11, 1 }
  0xc9   : > { %560 = vst [vmem:[%s265_s17] sm:$0x1] %v559_v12  ;;  %v569_v14 = vadd.f32 %v568_v13, %v567_v11 }
  0xcb   : > { %570 = vst [vmem:[%s268_s20] sm:$0x1] %v569_v14 }
  0xcc PF: > { %s17_s21 = sadd.s32 1, %s869_s21  }
  0xcd   : > { %p14_p4 = scmp.ge.s32.totalorder %s17_s21, 4  }
  0xcf   :  { %16 = sbr.rel (!%p14_p4) target bundleno = 1 (0x1), region = 92 }

// kernel: resnet_block_forward.5
= control target key start
LH: loop header
LB: loop body
LE: loop exit
PB: predicated region body
PF: predicated region fallthrough
CT: control target
= control target key end

     0   :  { %s370_s15 = smov 0   ;;  %s396_s0 = inlined_call_operand.vmem [shape: bf16[2,16,128], index: 0, kind: input, shape index: {}]   ;;  %s397_s1 = inlined_call_operand.vmem [shape: f32[1,128], index: 1, kind: input, shape index: {}]   ;;  %s398_s2 = inlined_call_operand.vmem [shape: f32[1,128], index: 2, kind: input, shape index: {}]   ;;  %s399_s3 = inlined_call_operand.vmem [shape: f32[2,16,128], index: 3, kind: input, shape index: {}]   ;;  %s400_s4 = inlined_call_operand.vmem [shape: f32[2,16,128], index: 4, kind: output, shape index: {}]  }
   0x1 LB: > { %s307_s16 = sadd.s32 4294967295, %s343_s15   ;;  %p311_p0 = scmp.ge.s32.totalorder %s343_s15, 1  ;;  %s343_s15 = sphi %s370_s15, %s14_s15  }
   0x2   : > { %p172_p1 = scmp.lt.s32.totalorder %s343_s15, 3 }
   0x4   : > { %p173_p2 = pnand %p311_p0, %p172_p1 }
   0x5   : > { %p203_p3 = scmp.lt.s32.totalorder (!%p173_p2), %s307_s16, 1 }
   0x6   : > { %176 = sbr.rel (%p173_p2) target bundleno = 25 (0x19), region = 36 }
   0xb   : > { %s402_s16 = smov (!%p203_p3, %s307_s16), 1  ;;  %v335_v0 = vld [vmem:[%s397_s1] ss:$0 sm:$0xff] }
   0xc   : > { %s320_s17 = sshll.u32 %s402_s16, 3  ;;  %s321_s18 = sshll.u32 %s402_s16, 4  ;;  %v336_v4 = vld [vmem:[%s398_s2] ss:$0 sm:$0xff] }
   0xd   : > { %s207_s21 = scalar_lea.vmem %s396_s0, %s320_s17  ;;  %s212_s26 = scalar_lea.vmem %s399_s3, %s321_s18 }
   0xe   : > { %v324_v1 = vld [vmem:[%s207_s21] sm:$0xff]   ;;  %v235_v8 = vld [vmem:[%s212_s26 + $0x8] sm:$0xff]  ;;  %s217_s5 = scalar_lea.vmem %s400_s4, %s321_s18 }
   0xf   : > { %v325_v2 = vunpack.c.l.bf16 %v324_v1  ;;  %v326_v3 = vunpack.c.h.bf16 %v324_v1  ;;  %v234_v7 = vld [vmem:[%s212_s26] sm:$0xff] }
  0x11   : > { %v226_v5 = vmul.f32 %v335_v0, %v325_v2  ;;  %v227_v6 = vmul.f32 %v335_v0, %v326_v3 }
  0x13   : > { %v232_v9 = vadd.f32 %v336_v4, %v226_v5  ;;  %v233_v10 = vadd.f32 %v336_v4, %v227_v6 }
  0x15   : > { %v236_v11 = vadd.f32 %v234_v7, %v232_v9  ;;  %v237_v12 = vadd.f32 %v235_v8, %v233_v10 }
  0x17   : > { %238 = vst [vmem:[%s217_s5] sm:$0xff] %v236_v11 }
  0x18   : > { %239 = vst [vmem:[%s217_s5 + $0x8] sm:$0xff] %v237_v12 }
  0x19 PF: > { %s14_s15 = sadd.s32 1, %s343_s15  }
  0x1a   : > { %p11_p4 = scmp.ge.s32.totalorder %s14_s15, 4  }
  0x1c   :  { %13 = sbr.rel (!%p11_p4) target bundleno = 1 (0x1), region = 69 }

</bundles_post_ra>
